<compile_context>
chip_gen: v5e
topology: v5e:2x2
jax: 0.10.0
libtpu: 0.0.40
codegen_flags: <defaults>
</compile_context>

<pallas_src>
import jax
import jax.numpy as jnp
from jax.experimental import pallas as pl
from jax.experimental.pallas import tpu as pltpu


def _round_up(x, m):
    return (x + m - 1) // m * m


def _cdiv(a, b):
    return (a + b - 1) // b


def rae_kernel(x_ref, we_ref, be_ref, wd_ref, bd_ref, o_ref):
    # Encoder: h = ReLU(x @ W_e + b_e).  x is cast to the MXU compute dtype
    # in-kernel (VPU cast, no extra HBM pass); both matmuls accumulate in f32
    # and bias-add / ReLU stay on the f32 accumulator.
    x = x_ref[...].astype(we_ref.dtype)
    h = jnp.dot(x, we_ref[...], preferred_element_type=jnp.float32)
    h = jnp.maximum(h + be_ref[...], 0.0)
    # Decoder: y = h @ W_d + b_d
    y = jnp.dot(h.astype(wd_ref.dtype), wd_ref[...],
                preferred_element_type=jnp.float32)
    o_ref[...] = (y + bd_ref[...]).astype(o_ref.dtype)


def prepare_rae_params(w_enc, b_enc, w_dec, b_dec, *,
                       compute_dtype=jnp.bfloat16, feature_align=128):
    """One-time (init) weight prep: pad the hidden dim to a lane multiple and
    cast to the MXU compute dtype, so the per-call path never touches weights.
    Padding is mathematically inert (zero weight rows/cols, zero bias)."""
    d_in, d_hid = w_enc.shape
    assert w_dec.shape == (d_hid, d_in)
    d_hid_p = _round_up(d_hid, feature_align)

    wep = jnp.zeros((d_in, d_hid_p), compute_dtype)
    wep = wep.at[:, :d_hid].set(w_enc.astype(compute_dtype))
    bep = jnp.zeros((1, d_hid_p), jnp.float32)
    bep = bep.at[0, :d_hid].set(b_enc.astype(jnp.float32))
    wdp = jnp.zeros((d_hid_p, d_in), compute_dtype)
    wdp = wdp.at[:d_hid, :].set(w_dec.astype(compute_dtype))
    bdp = b_dec.astype(jnp.float32).reshape(1, d_in)
    return wep, bep, wdp, bdp


def _choose_tm(rows, d_hid_p, *, tm_target=512, row_align=16,
               min_parallel_tiles=4):
    # Keep the f32 encoder intermediate (tm x d_hid_p x 4B) to a few MiB;
    # matters on v7x's 64 MiB VMEM when d_hid is large.
    max_tm_for_h = max(row_align,
                       ((8 << 20) // (d_hid_p * 4)) // row_align * row_align)
    tm_target = min(tm_target, max_tm_for_h)

    n_tiles = _cdiv(rows, tm_target)
    # v7x has 2 TensorCores: when the batch is big enough, guarantee enough
    # row tiles on the "parallel" axis to shard 2-way with pipeline depth.
    if rows >= min_parallel_tiles * 128:
        n_tiles = max(n_tiles, min_parallel_tiles)
    # Balanced tiles -> ragged padding of the last tile stays < one tile.
    tm = _round_up(_cdiv(rows, n_tiles), row_align)
    if tm >= rows:
        tm = rows  # single full-extent block (always a legal block shape)
    return tm


def rae_forward(x2d, wep, bep, wdp, bdp, *, tm_target=512, out_dtype=None):
    rows, d_in = x2d.shape
    d_hid_p = wep.shape[1]
    assert wep.shape[0] == d_in and wdp.shape == (d_hid_p, d_in)
    out_dtype = x2d.dtype if out_dtype is None else out_dtype

    tm = _choose_tm(rows, d_hid_p, tm_target=tm_target)
    grid = (_cdiv(rows, tm),)

    x_bytes = jnp.dtype(x2d.dtype).itemsize
    out_bytes = jnp.dtype(out_dtype).itemsize
    w_bytes = jnp.dtype(wep.dtype).itemsize

    # Explicit VMEM budget: single-buffered resident weights + double-buffered
    # x / y row tiles + f32 intermediates, with headroom.
    vmem_need = (
        (2 * d_in * d_hid_p) * w_bytes          # W_e + W_d (Buffered(1))
        + (d_hid_p + d_in) * 4                  # biases (f32)
        + 2 * tm * d_in * x_bytes               # x tile, double-buffered
        + 2 * tm * d_in * out_bytes             # y tile, double-buffered
        + 2 * tm * max(d_hid_p, d_in) * 4       # f32 h / y intermediates
    )
    vmem_limit = min(100 << 20,
                     max(16 << 20, int(1.5 * vmem_need) + (4 << 20)))

    cost = pl.CostEstimate(
        flops=2 * rows * d_in * d_hid_p * 2,     # two matmuls
        transcendentals=0,
        bytes_accessed=(rows * d_in * (x_bytes + out_bytes)
                        + 2 * d_in * d_hid_p * w_bytes
                        + (d_hid_p + d_in) * 4),
    )

    resident = dict(pipeline_mode=pl.Buffered(1))  # constant-index operands

    return pl.pallas_call(
        rae_kernel,
        out_shape=jax.ShapeDtypeStruct((rows, d_in), out_dtype),
        grid=grid,
        in_specs=[
            pl.BlockSpec((tm, d_in), lambda i: (i, 0)),                   # x
            pl.BlockSpec((d_in, d_hid_p), lambda i: (0, 0), **resident),  # W_e
            pl.BlockSpec((1, d_hid_p), lambda i: (0, 0), **resident),     # b_e
            pl.BlockSpec((d_hid_p, d_in), lambda i: (0, 0), **resident),  # W_d
            pl.BlockSpec((1, d_in), lambda i: (0, 0), **resident),        # b_d
        ],
        out_specs=pl.BlockSpec((tm, d_in), lambda i: (i, 0)),
        compiler_params=pltpu.CompilerParams(
            dimension_semantics=("parallel",),
            vmem_limit_bytes=vmem_limit),
        cost_estimate=cost,
    )(x2d, wep, bep, wdp, bdp)


def rae_reference(x2d, w_enc, b_enc, w_dec, b_dec):
    h = jnp.maximum(x2d @ w_enc + b_enc, 0.0)
    return h @ w_dec + b_dec


if __name__ == "__main__":
    # Small shapes consistent with the autoencoder forward:
    # batch=2, seq=8, input_dim=32, hidden=16.
    B, S, D_IN, D_HID = 2, 8, 32, 16

    key = jax.random.PRNGKey(0)
    kx, ke, kbe, kd, kbd = jax.random.split(key, 5)

    x = jax.random.normal(kx, (B, S, D_IN), dtype=jnp.float32)
    w_enc = jax.random.normal(ke, (D_IN, D_HID), dtype=jnp.float32) * 0.1
    b_enc = jax.random.normal(kbe, (D_HID,), dtype=jnp.float32) * 0.1
    w_dec = jax.random.normal(kd, (D_HID, D_IN), dtype=jnp.float32) * 0.1
    b_dec = jax.random.normal(kbd, (D_IN,), dtype=jnp.float32) * 0.1

    # One-time (model-init) weight prep, outside the per-call path.
    wep, bep, wdp, bdp = prepare_rae_params(w_enc, b_enc, w_dec, b_dec)

    x2d = x.reshape(B * S, D_IN)
    out2d = rae_forward(x2d, wep, bep, wdp, bdp)
    out = out2d.reshape(B, S, D_IN)
    jax.block_until_ready(out)

    # Correctness check against pure-JAX f32 reference (tolerance relaxed for
    # the bf16 MXU inputs).
    ref = rae_reference(x2d, w_enc, b_enc, w_dec, b_dec).reshape(B, S, D_IN)
    assert jnp.allclose(out, ref, atol=3e-2, rtol=3e-2), "mismatch vs reference"

    print("KERNEL_OK")
</pallas_src>

<mosaic_0001>
module attributes {stable_mosaic.version = 11 : i64} {
  func.func @rae_kernel(%arg0: i32, %arg1: memref<16x32xf32, #tpu.memory_space<vmem>>, %arg2: memref<32x128xbf16, #tpu.memory_space<vmem>>, %arg3: memref<1x128xf32, #tpu.memory_space<vmem>>, %arg4: memref<128x32xbf16, #tpu.memory_space<vmem>>, %arg5: memref<1x32xf32, #tpu.memory_space<vmem>>, %arg6: memref<16x32xf32, #tpu.memory_space<vmem>>) attributes {dimension_semantics = [#tpu.dimension_semantics<parallel>], iteration_bounds = array<i64: 1>, scalar_prefetch = 0 : i64, scratch_operands = 0 : i64, tpu.core_type = #tpu.core_type<tc>, window_params = [{transform_indices = @transform_0, window_bounds = array<i64: 16, 32>}, {pipeline_mode = #tpu.pipeline_mode<synchronous>, transform_indices = @transform_1, window_bounds = array<i64: 32, 128>}, {pipeline_mode = #tpu.pipeline_mode<synchronous>, transform_indices = @transform_2, window_bounds = array<i64: 1, 128>}, {pipeline_mode = #tpu.pipeline_mode<synchronous>, transform_indices = @transform_3, window_bounds = array<i64: 128, 32>}, {pipeline_mode = #tpu.pipeline_mode<synchronous>, transform_indices = @transform_4, window_bounds = array<i64: 1, 32>}, {transform_indices = @transform_5, window_bounds = array<i64: 16, 32>}]} {
    %c0 = arith.constant 0 : index
    %c0_0 = arith.constant 0 : index
    %0 = vector.load %arg1[%c0, %c0_0] : memref<16x32xf32, #tpu.memory_space<vmem>>, vector<16x32xf32>
    %1 = arith.truncf %0 : vector<16x32xf32> to vector<16x32xbf16>
    %c0_1 = arith.constant 0 : index
    %c0_2 = arith.constant 0 : index
    %2 = vector.load %arg2[%c0_1, %c0_2] : memref<32x128xbf16, #tpu.memory_space<vmem>>, vector<32x128xbf16>
    %cst = arith.constant dense<0.000000e+00> : vector<16x128xf32>
    %3 = tpu.matmul %1, %2, %cst {dimension_numbers = #tpu.dot_dimension_numbers<[1], [0], [0], [1], [0, 0, 1, 1], [], []>} : vector<16x32xbf16>, vector<32x128xbf16>, vector<16x128xf32> -> vector<16x128xf32>
    %c0_3 = arith.constant 0 : index
    %c0_4 = arith.constant 0 : index
    %4 = vector.load %arg3[%c0_3, %c0_4] : memref<1x128xf32, #tpu.memory_space<vmem>>, vector<1x128xf32>
    %5 = vector.broadcast %4 : vector<1x128xf32> to vector<16x128xf32>
    %6 = arith.addf %3, %5 : vector<16x128xf32>
    %cst_5 = arith.constant 0.000000e+00 : f32
    %7 = vector.broadcast %cst_5 : f32 to vector<16x128xf32>
    %8 = arith.maximumf %6, %7 : vector<16x128xf32>
    %9 = arith.truncf %8 : vector<16x128xf32> to vector<16x128xbf16>
    %c0_6 = arith.constant 0 : index
    %c0_7 = arith.constant 0 : index
    %10 = vector.load %arg4[%c0_6, %c0_7] : memref<128x32xbf16, #tpu.memory_space<vmem>>, vector<128x32xbf16>
    %cst_8 = arith.constant dense<0.000000e+00> : vector<16x32xf32>
    %11 = tpu.matmul %9, %10, %cst_8 {dimension_numbers = #tpu.dot_dimension_numbers<[1], [0], [0], [1], [0, 0, 1, 1], [], []>} : vector<16x128xbf16>, vector<128x32xbf16>, vector<16x32xf32> -> vector<16x32xf32>
    %c0_9 = arith.constant 0 : index
    %c0_10 = arith.constant 0 : index
    %12 = vector.load %arg5[%c0_9, %c0_10] : memref<1x32xf32, #tpu.memory_space<vmem>>, vector<1x32xf32>
    %13 = vector.broadcast %12 : vector<1x32xf32> to vector<16x32xf32>
    %14 = arith.addf %11, %13 : vector<16x32xf32>
    %c0_11 = arith.constant 0 : index
    %c0_12 = arith.constant 0 : index
    %15 = vector.load %arg6[%c0_11, %c0_12] : memref<16x32xf32, #tpu.memory_space<vmem>>, vector<16x32xf32>
    tpu.vector_store %arg6[%c0_11, %c0_12], %14 {strides = array<i32>} : memref<16x32xf32, #tpu.memory_space<vmem>>, vector<16x32xf32>,
    return
  }
  func.func @transform_0(%arg0: i32) -> (i32, i32) {
    %c0_i32 = arith.constant 0 : i32
    %c0_i32_0 = arith.constant 0 : i32
    return %arg0, %c0_i32 : i32, i32
  }
  func.func @transform_1(%arg0: i32) -> (i32, i32) {
    %c0_i32 = arith.constant 0 : i32
    %c0_i32_0 = arith.constant 0 : i32
    %c0_i32_1 = arith.constant 0 : i32
    return %c0_i32, %c0_i32_0 : i32, i32
  }
  func.func @transform_2(%arg0: i32) -> (i32, i32) {
    %c0_i32 = arith.constant 0 : i32
    %c0_i32_0 = arith.constant 0 : i32
    %c0_i32_1 = arith.constant 0 : i32
    return %c0_i32, %c0_i32_0 : i32, i32
  }
  func.func @transform_3(%arg0: i32) -> (i32, i32) {
    %c0_i32 = arith.constant 0 : i32
    %c0_i32_0 = arith.constant 0 : i32
    %c0_i32_1 = arith.constant 0 : i32
    return %c0_i32, %c0_i32_0 : i32, i32
  }
  func.func @transform_4(%arg0: i32) -> (i32, i32) {
    %c0_i32 = arith.constant 0 : i32
    %c0_i32_0 = arith.constant 0 : i32
    %c0_i32_1 = arith.constant 0 : i32
    return %c0_i32, %c0_i32_0 : i32, i32
  }
  func.func @transform_5(%arg0: i32) -> (i32, i32) {
    %c0_i32 = arith.constant 0 : i32
    %c0_i32_0 = arith.constant 0 : i32
    return %arg0, %c0_i32 : i32, i32
  }
}

</mosaic_0001>

<bundles_post_ra>
// kernel: tpu_custom_call.1
= control target key start
LH: loop header
LB: loop body
LE: loop exit
PB: predicated region body
PF: predicated region fallthrough
CT: control target
= control target key end

     0   :  { %s331_s0 = inlined_call_operand.vmem [shape: f32[16,32], index: 0, kind: input, shape index: {}]   ;;  %s332_s1 = inlined_call_operand.vmem [shape: bf16[32,128], index: 1, kind: input, shape index: {}]   ;;  %s333_s2 = inlined_call_operand.vmem [shape: f32[1,128], index: 2, kind: input, shape index: {}]   ;;  %s334_s3 = inlined_call_operand.vmem [shape: bf16[128,32], index: 3, kind: input, shape index: {}]   ;;  %s335_s4 = inlined_call_operand.vmem [shape: f32[1,32], index: 4, kind: input, shape index: {}]   ;;  %s336_s5 = inlined_call_operand.hbm [shape: f32[16,32], index: 5, kind: output, shape index: {}]  }
   0x1   :  { %v210_v0 = vld [vmem:[%s332_s1 + $0x8] sm:$0xff]  ;;  %v209_v1 = vld [vmem:[%s332_s1] sm:$0xff]  ;;  %v218_v2 = vld [vmem:[%s334_s3 + $0x38] sm:$0xff] }
   0x2   :  { %55 = vmatpush.bf16.msra.mxu0 %v210_v0  ;;  %v22_v3 = vld [vmem:[%s331_s0] sm:$0xff]  ;;  %v23_v4 = vld [vmem:[%s331_s0 + $0x8] sm:$0xff]  ;;  %134 = vmatpush.bf16.msra.mxu1 %v218_v2  ;;  %v217_v5 = vld [vmem:[%s334_s3 + $0x30] sm:$0xff] }
   0x3   :  { %10 = vsyncpa [#allocation3], 0  ;;  %v24_v6 = vpack.c.bf16 %v23_v4, %v22_v3  ;;  %vm45_vm0 = vcmask 261120   ;;  %v216_v7 = vld [vmem:[%s334_s3 + $0x28] sm:$0xff]  ;;  %v215_v8 = vld [vmem:[%s334_s3 + $0x20] sm:$0xff]  ;;  %s251_s22 = smov 128  }
   0x4   :  { %v214_v9 = vld [vmem:[%s334_s3 + $0x18] sm:$0xff]  ;;  %v213_v10 = vld [vmem:[%s334_s3 + $0x10] sm:$0xff]  ;;  %v212_v11 = vld [vmem:[%s334_s3 + $0x8] sm:$0xff]  ;;  %s252_s23 = smov 8  }
   0x5   :  { %v211_v12 = vld [vmem:[%s334_s3] sm:$0xff]  ;;  %s250_s3 = smov [#allocation2]  }
   0x6   :  { %56 = vmatpush.bf16.msra.mxu0 %v209_v1  ;;  %135 = vmatpush.bf16.msra.mxu1 %v217_v5  ;;  %v222_v14 = vld [vmem:[%s333_s2] ss:$0 sm:$0xff]  ;;  %s154_s19 = sshll.u32 %s250_s3, 4  ;;  %s156_s2 = sshll.u32 %s336_s5, 4  ;;  %s155_s19 = int_to_ptr.vmem [resolvable:$true] %s154_s19  ;;  %s157_s2 = int_to_ptr.hbm [resolvable:$true] %s156_s2 }
   0x7   :  { %v223_v21 = vld [vmem:[%s335_s4] ss:$0 sm:$0xff] }
   0x9   :  { %176 = vmatmul.msk.bf16.vlgmr.msra.gmra.mxu0 %vm45_vm0, %v24_v6 }
   0xa   :  { %136 = vmatpush.bf16.msra.mxu1 %v216_v7 }
   0xe   :  { %137 = vmatpush.bf16.msra.mxu1 %v215_v8 }
  0x12   :  { %138 = vmatpush.bf16.msra.mxu1 %v214_v9 }
  0x16   :  { %139 = vmatpush.bf16.msra.mxu1 %v213_v10 }
  0x1a   :  { %140 = vmatpush.bf16.msra.mxu1 %v212_v11 }
  0x1e   :  { %141 = vmatpush.bf16.msra.mxu1 %v211_v12 }
  0x86   :  { %v58_v13 = vpop.f32.mrf.mxu0 }
  0x87   :  { %v59_v15 = vadd.f32 %v222_v14, %v58_v13 }
  0x89   :  { %v63_v18 = vmax.f32 %v59_v15, 0.0 }
  0x8e   :  { %v60_v16 = vpop.f32.mrf.mxu0 }
  0x8f   :  { %v61_v17 = vadd.f32 %v222_v14, %v60_v16 }
  0x91   :  { %v64_v19 = vmax.f32 %v61_v17, 0.0 }
  0x93   :  { %v65_v20 = vpack.c.bf16 %v64_v19, %v63_v18 }
  0x95   :  { %142 = vmatmul.bf16.vlgmr.msra.gmra.mxu1 %v65_v20 }
 0x112   :  { %v143_v22 = vpop.f32.mrf.mxu1 }
 0x113   :  { %v144_v23 = vadd.f32 %v223_v21, %v143_v22 }
 0x115   :  { %148 = vst.msk [vmem:[#allocation2] sm:$0xff] %vm45_vm0, %v144_v23 }
 0x11a   :  { %v145_v24 = vpop.f32.mrf.mxu1 }
 0x11b   :  { %v146_v25 = vadd.f32 %v223_v21, %v145_v24 }
 0x11d   :  { %149 = vst.msk [vmem:[#allocation2 + $0x8] sm:$0xff] %vm45_vm0, %v146_v25 }
 0x11e   :  { %162 = dma.vmem_to_hbm [thread:$0]  %s155_s19, 256, %s157_s2, [#allocation3], %s251_s22, %s251_s22, %s252_s23  }
 0x11f   :  { %248 = dma.done.wait [#allocation3], 256  }
 0x120   :  { %249 = vsyncadd [#allocation3], 4294967040 }
 0x121   :  { %167 = vsyncpa [#allocation3], 1 }

</bundles_post_ra>
